<compile_context>
chip_gen: v5e
topology: v5e:2x2
jax: 0.10.0
libtpu: 0.0.40
codegen_flags: <defaults>
</compile_context>

<pallas_src>
import jax
import jax.numpy as jnp
from jax.experimental import pallas as pl
from jax.experimental.pallas import tpu as pltpu


def _color_rate_kernel(pre_ref, cur_ref, out_ref, acc_ref):
    s = pl.program_id(1)

    @pl.when(s == 0)
    def _():
        acc_ref[...] = jnp.zeros_like(acc_ref)

    # Per-channel *255 + floor (inputs are non-negative so trunc == floor).
    # Channel slices come straight off the (1, 3, TH, W) VMEM block; no full
    # scaled (1,3,TH,W) temporary is materialized.
    r_p = jnp.floor(pre_ref[0, 0] * 255.0)
    g_p = jnp.floor(pre_ref[0, 1] * 255.0)
    b_p = jnp.floor(pre_ref[0, 2] * 255.0)
    r_c = jnp.floor(cur_ref[0, 0] * 255.0)
    g_c = jnp.floor(cur_ref[0, 1] * 255.0)
    b_c = jnp.floor(cur_ref[0, 2] * 255.0)

    # Integer floor-division a//b emulated exactly with a correctly-rounded f32
    # divide + floor: operands are integers in [0, 255], so the gap to the next
    # integer quotient is >= 1/255 >> f32 ulp.  (Deliberately NOT using
    # pl.reciprocal(approx=True): its ~2^-12 error can flip floor() near exact
    # integer quotients.)
    drg = jnp.floor(r_p / g_p) - jnp.floor(r_c / g_c)
    drb = jnp.floor(r_p / b_p) - jnp.floor(r_c / b_c)
    dgb = jnp.floor(g_p / b_p) - jnp.floor(g_c / b_c)

    # Vector-wise accumulation into VMEM scratch; no per-step XLU reduce and no
    # per-step read-modify-write of the (1,1,1) output block.
    acc_ref[...] += drg * drg + drb * drb + dgb * dgb

    @pl.when(s == pl.num_programs(1) - 1)
    def _():
        out_ref[...] = jnp.sum(acc_ref[...]).reshape(1, 1, 1)


def _choose_tile_h(h, w, max_block_bytes):
    """Largest TH (multiple of 8, dividing H) s.t. one f32 (1,3,TH,W) block fits budget."""
    if 12 * h * w <= max_block_bytes:
        return h                      # whole image per grid step (small inputs)
    if h % 8 != 0:
        # TODO(synk): for huge images with H not a multiple of 8, pad H in the
        # wrapper instead of falling back to a full-H block.
        return h
    cap = max(8, (max_block_bytes // (12 * w)) // 8 * 8)
    th = min(cap, h)
    while th > 8 and h % th != 0:
        th -= 8
    return max(th, 8)


def l_color_rate(pre, cur, *, max_block_bytes=3 << 20):
    b, c, h, w = pre.shape
    assert c == 3, "L_color_rate expects 3-channel (RGB) input"
    pre = pre.astype(jnp.float32)
    cur = cur.astype(jnp.float32)

    th = _choose_tile_h(h, w, max_block_bytes)
    n_s = h // th if h % th == 0 else 1
    if n_s == 1:
        th = h

    partials = pl.pallas_call(
        _color_rate_kernel,
        out_shape=jax.ShapeDtypeStruct((b, 1, 1), jnp.float32),
        grid_spec=pltpu.PrefetchScalarGridSpec(
            num_scalar_prefetch=0,
            grid=(b, n_s),
            in_specs=[
                pl.BlockSpec((1, 3, th, w), lambda i, s: (i, 0, s, 0)),
                pl.BlockSpec((1, 3, th, w), lambda i, s: (i, 0, s, 0)),
            ],
            out_specs=pl.BlockSpec((1, 1, 1), lambda i, s: (i, 0, 0)),
            scratch_shapes=[pltpu.VMEM((th, w), jnp.float32)],
        ),
        compiler_params=pltpu.CompilerParams(
            # batch: independent -> megacore shardable on v7x;
            # spatial tiles: reduction -> arbitrary (last axis).
            dimension_semantics=("parallel", "arbitrary"),
        ),
    )(pre, cur)

    total = jnp.sum(partials)
    return jnp.sqrt(total / (255.0 ** 2))


def _l_color_rate_ref(pre, cur):
    """Pure-JAX reference mirroring the PyTorch module."""
    p = (pre * 255.0).astype(jnp.int32)
    c = (cur * 255.0).astype(jnp.int32)
    rp, gp, bp = p[:, 0], p[:, 1], p[:, 2]
    rc, gc, bc = c[:, 0], c[:, 1], c[:, 2]
    drg = jnp.sum(((rp // gp) - (rc // gc)).astype(jnp.float32) ** 2) / 255.0 ** 2
    drb = jnp.sum(((rp // bp) - (rc // bc)).astype(jnp.float32) ** 2) / 255.0 ** 2
    dgb = jnp.sum(((gp // bp) - (gc // bc)).astype(jnp.float32) ** 2) / 255.0 ** 2
    return jnp.sqrt(drg + drb + dgb)


if __name__ == "__main__":
    key = jax.random.PRNGKey(0)
    k1, k2 = jax.random.split(key)
    B, C, H, W = 2, 3, 16, 16
    # Values in [0.2, 1.0] so integer denominators are >= 51 (PyTorch's
    # integer division by zero is undefined anyway).
    pre = jax.random.uniform(k1, (B, C, H, W), jnp.float32, minval=0.2, maxval=1.0)
    cur = jax.random.uniform(k2, (B, C, H, W), jnp.float32, minval=0.2, maxval=1.0)

    k = l_color_rate(pre, cur)
    jax.block_until_ready(k)
    assert k.shape == () and k.dtype == jnp.float32

    ref = _l_color_rate_ref(pre, cur)
    assert jnp.allclose(k, ref, rtol=1e-5, atol=1e-5), (k, ref)
    print("KERNEL_OK")
</pallas_src>

<mosaic_0001>
module attributes {stable_mosaic.version = 11 : i64} {
  func.func @_color_rate_kernel(%arg0: i32, %arg1: i32, %arg2: memref<1x3x16x16xf32, #tpu.memory_space<vmem>>, %arg3: memref<1x3x16x16xf32, #tpu.memory_space<vmem>>, %arg4: memref<1x1x1xf32, #tpu.memory_space<vmem>>, %arg5: memref<16x16xf32, #tpu.memory_space<vmem>>) attributes {dimension_semantics = [#tpu.dimension_semantics<parallel>, #tpu.dimension_semantics<arbitrary>], iteration_bounds = array<i64: 2, 1>, scalar_prefetch = 0 : i64, scratch_operands = 1 : i64, tpu.core_type = #tpu.core_type<tc>, window_params = [{transform_indices = @transform_0, window_bounds = array<i64: 1, 3, 16, 16>}, {transform_indices = @transform_1, window_bounds = array<i64: 1, 3, 16, 16>}, {transform_indices = @transform_2, window_bounds = array<i64: 1, 1, 1>}]} {
    %c0_i32 = arith.constant 0 : i32
    %0 = arith.cmpi eq, %arg1, %c0_i32 : i32
    %1 = arith.extui %0 : i1 to i32
    %c0_i32_0 = arith.constant 0 : i32
    %2 = arith.cmpi ne, %1, %c0_i32_0 : i32
    scf.if %2 {
      %cst_33 = arith.constant 0.000000e+00 : f32
      %59 = vector.broadcast %cst_33 : f32 to vector<16x16xf32>
      %c0_34 = arith.constant 0 : index
      %c0_35 = arith.constant 0 : index
      %60 = vector.load %arg5[%c0_34, %c0_35] : memref<16x16xf32, #tpu.memory_space<vmem>>, vector<16x16xf32>
      tpu.vector_store %arg5[%c0_34, %c0_35], %59 {strides = array<i32>} : memref<16x16xf32, #tpu.memory_space<vmem>>, vector<16x16xf32>,
    } else {
    }
    %c0 = arith.constant 0 : index
    %c0_1 = arith.constant 0 : index
    %c0_2 = arith.constant 0 : index
    %c0_3 = arith.constant 0 : index
    %3 = vector.load %arg2[%c0, %c0_1, %c0_2, %c0_3] : memref<1x3x16x16xf32, #tpu.memory_space<vmem>>, vector<1x1x16x16xf32>
    %4 = vector.shape_cast %3 : vector<1x1x16x16xf32> to vector<16x16xf32>
    %cst = arith.constant 2.550000e+02 : f32
    %5 = vector.broadcast %cst : f32 to vector<16x16xf32>
    %6 = arith.mulf %4, %5 : vector<16x16xf32>
    %7 = math.floor %6 : vector<16x16xf32>
    %c0_4 = arith.constant 0 : index
    %c1 = arith.constant 1 : index
    %c0_5 = arith.constant 0 : index
    %c0_6 = arith.constant 0 : index
    %8 = vector.load %arg2[%c0_4, %c1, %c0_5, %c0_6] : memref<1x3x16x16xf32, #tpu.memory_space<vmem>>, vector<1x1x16x16xf32>
    %9 = vector.shape_cast %8 : vector<1x1x16x16xf32> to vector<16x16xf32>
    %cst_7 = arith.constant 2.550000e+02 : f32
    %10 = vector.broadcast %cst_7 : f32 to vector<16x16xf32>
    %11 = arith.mulf %9, %10 : vector<16x16xf32>
    %12 = math.floor %11 : vector<16x16xf32>
    %c0_8 = arith.constant 0 : index
    %c2 = arith.constant 2 : index
    %c0_9 = arith.constant 0 : index
    %c0_10 = arith.constant 0 : index
    %13 = vector.load %arg2[%c0_8, %c2, %c0_9, %c0_10] : memref<1x3x16x16xf32, #tpu.memory_space<vmem>>, vector<1x1x16x16xf32>
    %14 = vector.shape_cast %13 : vector<1x1x16x16xf32> to vector<16x16xf32>
    %cst_11 = arith.constant 2.550000e+02 : f32
    %15 = vector.broadcast %cst_11 : f32 to vector<16x16xf32>
    %16 = arith.mulf %14, %15 : vector<16x16xf32>
    %17 = math.floor %16 : vector<16x16xf32>
    %c0_12 = arith.constant 0 : index
    %c0_13 = arith.constant 0 : index
    %c0_14 = arith.constant 0 : index
    %c0_15 = arith.constant 0 : index
    %18 = vector.load %arg3[%c0_12, %c0_13, %c0_14, %c0_15] : memref<1x3x16x16xf32, #tpu.memory_space<vmem>>, vector<1x1x16x16xf32>
    %19 = vector.shape_cast %18 : vector<1x1x16x16xf32> to vector<16x16xf32>
    %cst_16 = arith.constant 2.550000e+02 : f32
    %20 = vector.broadcast %cst_16 : f32 to vector<16x16xf32>
    %21 = arith.mulf %19, %20 : vector<16x16xf32>
    %22 = math.floor %21 : vector<16x16xf32>
    %c0_17 = arith.constant 0 : index
    %c1_18 = arith.constant 1 : index
    %c0_19 = arith.constant 0 : index
    %c0_20 = arith.constant 0 : index
    %23 = vector.load %arg3[%c0_17, %c1_18, %c0_19, %c0_20] : memref<1x3x16x16xf32, #tpu.memory_space<vmem>>, vector<1x1x16x16xf32>
    %24 = vector.shape_cast %23 : vector<1x1x16x16xf32> to vector<16x16xf32>
    %cst_21 = arith.constant 2.550000e+02 : f32
    %25 = vector.broadcast %cst_21 : f32 to vector<16x16xf32>
    %26 = arith.mulf %24, %25 : vector<16x16xf32>
    %27 = math.floor %26 : vector<16x16xf32>
    %c0_22 = arith.constant 0 : index
    %c2_23 = arith.constant 2 : index
    %c0_24 = arith.constant 0 : index
    %c0_25 = arith.constant 0 : index
    %28 = vector.load %arg3[%c0_22, %c2_23, %c0_24, %c0_25] : memref<1x3x16x16xf32, #tpu.memory_space<vmem>>, vector<1x1x16x16xf32>
    %29 = vector.shape_cast %28 : vector<1x1x16x16xf32> to vector<16x16xf32>
    %cst_26 = arith.constant 2.550000e+02 : f32
    %30 = vector.broadcast %cst_26 : f32 to vector<16x16xf32>
    %31 = arith.mulf %29, %30 : vector<16x16xf32>
    %32 = math.floor %31 : vector<16x16xf32>
    %33 = arith.divf %7, %12 : vector<16x16xf32>
    %34 = math.floor %33 : vector<16x16xf32>
    %35 = arith.divf %22, %27 : vector<16x16xf32>
    %36 = math.floor %35 : vector<16x16xf32>
    %37 = arith.subf %34, %36 : vector<16x16xf32>
    %38 = arith.divf %7, %17 : vector<16x16xf32>
    %39 = math.floor %38 : vector<16x16xf32>
    %40 = arith.divf %22, %32 : vector<16x16xf32>
    %41 = math.floor %40 : vector<16x16xf32>
    %42 = arith.subf %39, %41 : vector<16x16xf32>
    %43 = arith.divf %12, %17 : vector<16x16xf32>
    %44 = math.floor %43 : vector<16x16xf32>
    %45 = arith.divf %27, %32 : vector<16x16xf32>
    %46 = math.floor %45 : vector<16x16xf32>
    %47 = arith.subf %44, %46 : vector<16x16xf32>
    %c0_27 = arith.constant 0 : index
    %c0_28 = arith.constant 0 : index
    %48 = vector.load %arg5[%c0_27, %c0_28] : memref<16x16xf32, #tpu.memory_space<vmem>>, vector<16x16xf32>
    %49 = arith.mulf %37, %37 : vector<16x16xf32>
    %50 = arith.mulf %42, %42 : vector<16x16xf32>
    %51 = arith.addf %49, %50 : vector<16x16xf32>
    %52 = arith.mulf %47, %47 : vector<16x16xf32>
    %53 = arith.addf %51, %52 : vector<16x16xf32>
    %54 = arith.addf %48, %53 : vector<16x16xf32>
    %c0_29 = arith.constant 0 : index
    %c0_30 = arith.constant 0 : index
    %55 = vector.load %arg5[%c0_29, %c0_30] : memref<16x16xf32, #tpu.memory_space<vmem>>, vector<16x16xf32>
    tpu.vector_store %arg5[%c0_29, %c0_30], %54 {strides = array<i32>} : memref<16x16xf32, #tpu.memory_space<vmem>>, vector<16x16xf32>,
    %c0_i32_31 = arith.constant 0 : i32
    %56 = arith.cmpi eq, %arg1, %c0_i32_31 : i32
    %57 = arith.extui %56 : i1 to i32
    %c0_i32_32 = arith.constant 0 : i32
    %58 = arith.cmpi ne, %57, %c0_i32_32 : i32
    scf.if %58 {
      %c0_33 = arith.constant 0 : index
      %c0_34 = arith.constant 0 : index
      %59 = vector.load %arg5[%c0_33, %c0_34] : memref<16x16xf32, #tpu.memory_space<vmem>>, vector<16x16xf32>
      %60 = vector.shape_cast %59 : vector<16x16xf32> to vector<1x16x16xf32>
      %cst_35 = arith.constant dense<0.000000e+00> : vector<1xf32>
      %61 = vector.multi_reduction <add>, %60, %cst_35 [1, 2] : vector<1x16x16xf32> to vector<1xf32>
      %62 = vector.shape_cast %61 : vector<1xf32> to vector<1x1x1xf32>
      %63 = vector.extract %62[0, 0, 0] : f32 from vector<1x1x1xf32>
      %64 = vector.broadcast %63 : f32 to vector<1x1x1xf32>
      %c0_36 = arith.constant 0 : index
      %c0_37 = arith.constant 0 : index
      %c0_38 = arith.constant 0 : index
      %65 = vector.load %arg4[%c0_36, %c0_37, %c0_38] : memref<1x1x1xf32, #tpu.memory_space<vmem>>, vector<1x1x1xf32>
      tpu.vector_store %arg4[%c0_36, %c0_37, %c0_38], %64 {strides = array<i32>} : memref<1x1x1xf32, #tpu.memory_space<vmem>>, vector<1x1x1xf32>,
    } else {
    }
    return
  }
  func.func @transform_0(%arg0: i32, %arg1: i32) -> (i32, i32, i32, i32) {
    %c0_i32 = arith.constant 0 : i32
    %c0_i32_0 = arith.constant 0 : i32
    %c0_i32_1 = arith.constant 0 : i32
    return %arg0, %c0_i32, %arg1, %c0_i32_0 : i32, i32, i32, i32
  }
  func.func @transform_1(%arg0: i32, %arg1: i32) -> (i32, i32, i32, i32) {
    %c0_i32 = arith.constant 0 : i32
    %c0_i32_0 = arith.constant 0 : i32
    %c0_i32_1 = arith.constant 0 : i32
    return %arg0, %c0_i32, %arg1, %c0_i32_0 : i32, i32, i32, i32
  }
  func.func @transform_2(%arg0: i32, %arg1: i32) -> (i32, i32, i32) {
    %c0_i32 = arith.constant 0 : i32
    %c0_i32_0 = arith.constant 0 : i32
    %c0_i32_1 = arith.constant 0 : i32
    return %arg0, %c0_i32, %c0_i32_0 : i32, i32, i32
  }
}

</mosaic_0001>

<bundles_post_ra>
// kernel: tpu_custom_call.1
= control target key start
LH: loop header
LB: loop body
LE: loop exit
PB: predicated region body
PF: predicated region fallthrough
CT: control target
= control target key end

     0   :  { %7 = vsyncpa [#allocation4], 0  ;;  %s1086_s0 = inlined_call_operand.hbm [shape: f32[2,3,16,16], index: 0, kind: input, shape index: {}]   ;;  %s1087_s1 = inlined_call_operand.hbm [shape: f32[2,3,16,16], index: 1, kind: input, shape index: {}]   ;;  %s1088_s2 = inlined_call_operand.vmem [shape: f32[2,1,1], index: 2, kind: output, shape index: {}]  }
   0x1   :  { %9 = vsyncpa [#allocation4 + $0x1], 0 }
   0x2   :  { %10 = vsyncpa [#allocation6], 0 }
   0x3   :  { %12 = vsyncpa [#allocation6 + $0x1], 0  ;;  %s785_s9 = smov 0   ;;  %s787_s10 = smov 0  }
   0x4   :  { %s789_s11 = smov 0   ;;  %s791_s12 = smov 0  }
   0x5   :  { %s793_s13 = smov 0   ;;  %s795_s14 = smov 0  }
   0x6 LB: > { %s548_s15 = sadd.s32 4294967295, %s765_s14   ;;  %s30_s16 = sadd.s32 1, %s761_s13  ;;  %s765_s14 = sphi %s795_s14, %s18_s14   ;;  %s761_s13 = sphi %s793_s13, %s1119_s13   ;;  %s757_s12 = sphi %s791_s12, %s1118_s12   ;;  %s753_s11 = sphi %s789_s11, %s1117_s11   ;;  %s749_s10 = sphi %s787_s10, %s1116_s10   ;;  %s745_s9 = sphi %s785_s9, %s1115_s9  }
   0x7   : > { %p32_p0 = scmp.ge.s32.totalorder %s30_s16, 2  ;;  %s39_s17 = sadd.s32 1, %s753_s11 }
   0x8   : > { %p46_p1 = scmp.ne.s32.totalorder %s753_s11, %s749_s10  ;;  %p47_p2 = scmp.eq.s32.totalorder %s765_s14, 0 }
   0x9   : > { %s1121_s16 = smov (%p32_p0, %s30_s16), 0  ;;  %p52_p4 = scmp.ne.s32.totalorder %s749_s10, %s745_s9 }
   0xa   : > { %p48_p3 = por %p47_p2, %p46_p1  ;;  %s34_s18 = ssub.s32 %s761_s13, %s1121_s16 }
   0xb   : > { %p53_p5 = scmp.eq.s32.totalorder %s548_s15, 0  ;;  %p37_p6 = scmp.eq.s32.totalorder %s34_s18, 0 }
   0xc   : > { %p583_p8 = scmp.lt.s32.totalorder %s765_s14, 2  ;;  %s833_s21 = sand.u32 1, %s753_s11  }
   0xd   : > { %p824_p7 = por %p53_p5, %p52_p4  ;;  %s566_s22 = smul.u32 48, %s761_s13 }
   0xe   : > { %s830_s20 = scalar_select %p37_p6, %s753_s11, %s39_s17  }
   0xf   : > { %s565_s23 = smul.u32 48, %s833_s21  ;;  %s141_s26 = scalar_lea.hbm %s1086_s0, %s566_s22 }
  0x10   : > { %p840_p9 = pnand %p583_p8, %p48_p3  ;;  %s142_s28 = sshll.u32 %s141_s26, 4  ;;  %s143_s28 = int_to_ptr.hbm [resolvable:$true] %s142_s28 }
  0x11   : > { %s134_s29 = scalar_lea.vmem [#allocation3], %s565_s23  ;;  %s131_s3 = scalar_lea.sflag [#allocation4], %s833_s21 }
  0x12   : > { %s144_s30 = sshll.u32 %s134_s29, 4  ;;  %s767_s4 = smov 128   ;;  %s145_s30 = int_to_ptr.vmem [resolvable:$true] %s144_s30 }
  0x13   : > { %s768_s5 = smov 8   ;;  %p554_p10 = scmp.ge.s32.totalorder %s765_s14, 1 }
  0x14   : > { %579 = dma.hbm_to_vmem [thread:$0]  (!%p840_p9), %s143_s28, 768, %s145_s30, %s131_s3, %s767_s4, %s767_s4, %s768_s5  }
  0x15   : > { %p176_p11 = scmp.lt.s32.totalorder %s765_s14, 3  ;;  %s165_s8 = scalar_lea.hbm %s1087_s1, %s566_s22 }
  0x16   : > { %s166_s9 = sshll.u32 %s165_s8, 4  ;;  %s158_s15 = scalar_lea.vmem [#allocation5], %s565_s23  ;;  %s167_s9 = int_to_ptr.hbm [resolvable:$true] %s166_s9 }
  0x17   : > { %p177_p12 = pnand %p554_p10, %p176_p11  ;;  %s168_s17 = sshll.u32 %s158_s15, 4  ;;  %s169_s17 = int_to_ptr.vmem [resolvable:$true] %s168_s17 }
  0x18   : > { %s155_s18 = scalar_lea.sflag [#allocation6], %s833_s21  ;;  %s182_s24 = sand.u32 (!%p177_p12), 1, %s749_s10  }
  0x19   : > { %582 = dma.hbm_to_vmem [thread:$0]  (!%p840_p9), %s167_s9, 768, %s169_s17, %s155_s18, %s767_s4, %s767_s4, %s768_s5  }
  0x1a   : > { %180 = sbr.rel (%p177_p12) target bundleno = 284 (0x11c), region = 28  ;;  %s183_s26 = scalar_lea.sflag (!%p177_p12), [#allocation4], %s182_s24 }
  0x1b   : > { %s569_s25 = smul.u32 (!%p177_p12), 48, %s182_s24 }
  0x1d   : > { %s186_s28 = scalar_lea.vmem (!%p177_p12), [#allocation3], %s569_s25 }
  0x1f   : > { %736 = dma.done.wait (%p824_p7), %s183_s26, 768  }
  0x20   : > { %738 = vsyncadd (%p824_p7), %s183_s26, 4294966528  ;;  %s193_s22 = scalar_lea.sflag [#allocation6], %s182_s24  ;;  %s196_s23 = scalar_lea.vmem [#allocation5], %s569_s25 }
  0x21   : > { %740 = dma.done.wait (%p824_p7), %s193_s22, 768  }
  0x22   : > { %742 = vsyncadd (%p824_p7), %s193_s22, 4294966528  ;;  %vm230_vm0 = vcmask 130048   ;;  %v769_v0 = vmov 0.0   ;;  %v555_v1 = vld [vmem:[%s186_s28 + $0x10] sm:$0xff]  ;;  %v556_v2 = vld [vmem:[%s186_s28 + $0x18] sm:$0xff]  ;;  %p223_p13 = scmp.lt.s32.totalorder %s757_s12, 1 }
  0x23   : > { %231 = vst.msk [vmem:[#allocation2] sm:$0xff] %vm230_vm0, %v769_v0  ;;  %v242_v3 = vmul.f32 255.0, %v555_v1  ;;  %v243_v4 = vmul.f32 255.0, %v556_v2  ;;  %v557_v5 = vld [vmem:[%s186_s28 + $0x20] sm:$0xff]  ;;  %v559_v6 = vld [vmem:[%s196_s23 + $0x10] sm:$0xff]  ;;  %v560_v8 = vld [vmem:[%s196_s23 + $0x18] sm:$0xff] }
  0x24   : > { %232 = vst.msk [vmem:[#allocation2 + $0x8] sm:$0xff] %vm230_vm0, %v769_v0  ;;  %v233_v9 = vld [vmem:[%s186_s28] sm:$0xff]  ;;  %v558_v11 = vld [vmem:[%s186_s28 + $0x28] sm:$0xff]  ;;  %v249_v12 = vmul.f32 255.0, %v557_v5  ;;  %v262_v14 = vmul.f32 255.0, %v559_v6  ;;  %v263_v15 = vmul.f32 255.0, %v560_v8 }
  0x25   : > { %v866_v7 = vfloor.f32 %v242_v3  ;;  %v868_v10 = vfloor.f32 %v243_v4  ;;  %v253_v13 = vld [vmem:[%s196_s23] sm:$0xff]  ;;  %v562_v17 = vld [vmem:[%s196_s23 + $0x28] sm:$0xff]  ;;  %v871_v19 = vmul.f32 255.0, %v233_v9  ;;  %v250_v20 = vmul.f32 255.0, %v558_v11  ;;  %s1123_s12 = smov (!%p223_p13, %s757_s12), 1 }
  0x26   : > { %v561_v16 = vld [vmem:[%s196_s23 + $0x20] sm:$0xff]  ;;  %v234_v18 = vld [vmem:[%s186_s28 + $0x8] sm:$0xff]  ;;  %v873_v21 = vfloor.f32 %v262_v14  ;;  %v875_v22 = vfloor.f32 %v263_v15  ;;  %v877_v24 = vmul.f32 255.0, %v253_v13  ;;  %v880_v26 = vfloor.f32 %v249_v12  ;;  %s225_s27 = scalar_lea.vmem %s1088_s2, %s1123_s12 }
  0x27   : > { %635 = vrcp.f32 %v866_v7  ;;  %v254_v23 = vld [vmem:[%s196_s23 + $0x8] sm:$0xff]  ;;  %v269_v25 = vmul.f32 255.0, %v561_v16  ;;  %v270_v27 = vmul.f32 255.0, %v562_v17  ;;  %v883_v28 = vmul.f32 255.0, %v234_v18 }
  0x28   : > { %637 = vrcp.f32 %v868_v10  ;;  %v282_v29 = vand.u32 2147483647, %v866_v7  ;;  %v284_v30 = vand.u32 2147483648, %v866_v7  ;;  %v237_v31 = vfloor.f32 %v871_v19 }
  0x29   : > { %639 = vrcp.f32 %v873_v21  ;;  %v888_v32 = vfloor.f32 %v250_v20  ;;  %v890_v33 = vmul.f32 255.0, %v254_v23  ;;  %v257_v35 = vfloor.f32 %v877_v24 }
  0x2a   : > { %641 = vrcp.f32 %v875_v22  ;;  %v894_v36 = vfloor.f32 %v269_v25  ;;  %vm278_vm1 = vweird.f32 %v866_v7  ;;  %v299_v37 = vand.u32 2147483648, %v868_v10 }
  0x2b   : > { %v898_v38 = vfloor.f32 %v270_v27  ;;  %v314_v40 = vand.u32 2147483647, %v873_v21  ;;  %643 = vrcp.f32 %v880_v26  ;;  %vm905_vm2 = vcmp.eq.f32.partialorder %v282_v29, 8.507059e+37 }
  0x2c   : > { %v285_v43 = vor.u32 1.1754944e-38, %v284_v30  ;;  %v297_v44 = vand.u32 2147483647, %v868_v10  ;;  %v316_v45 = vand.u32 2147483648, %v873_v21  ;;  %vm293_vm4 = vweird.f32 %v868_v10 }
  0x2d   : > { %v636_v34 = vpop.eup %635  ;;  %645 = vrcp.f32 %v888_v32  ;;  %v915_v49 = vor.u32 1.1754944e-38, %v299_v37  ;;  %vm310_vm5 = vweird.f32 %v873_v21  ;;  %vm325_vm6 = vweird.f32 %v875_v22 }
  0x2e   : > { %v274_v39 = vmul.f32 %v636_v34, %v866_v7  ;;  %v903_v41 = vpop.eup %637  ;;  %vm279_vm3 = vweird.f32 %v636_v34  ;;  %vm922_vm7 = vcmp.eq.f32.partialorder %v314_v40, 8.507059e+37  ;;  %v331_v55 = vand.u32 2147483648, %v875_v22 }
  0x2f   : > { %v640_v46 = vpop.eup %639  ;;  %v289_v48 = vmul.f32 %v903_v41, %v868_v10  ;;  %vm929_vm8 = vmor %vm278_vm1, %vm279_vm3  ;;  %v317_v58 = vor.u32 1.1754944e-38, %v316_v45  ;;  %v329_v62 = vand.u32 2147483647, %v875_v22  ;;  %v348_v63 = vand.u32 2147483647, %v880_v26 }
  0x30   : > { %v275_v47 = vsub.f32 1.0, %v274_v39  ;;  %v306_v50 = vmul.f32 %v640_v46, %v873_v21  ;;  %v920_v51 = vpop.eup %641  ;;  %vm311_vm9 = vweird.f32 %v640_v46  ;;  %647 = vrcp.f32 %v894_v36 }
  0x31   : > { %v290_v53 = vsub.f32 1.0, %v289_v48  ;;  %v321_v59 = vmul.f32 %v920_v51, %v875_v22  ;;  %v644_v60 = vpop.eup %643  ;;  %v350_v3 = vand.u32 2147483648, %v880_v26  ;;  %vm948_vm10 = vmor %vm310_vm5, %vm311_vm9  ;;  %v332_v9 = vor.u32 1.1754944e-38, %v331_v55 }
  0x32   : > { %v276_v52 = vmul.f32 %v636_v34, %v275_v47  ;;  %v307_v57 = vsub.f32 1.0, %v306_v50  ;;  %v340_v2 = vmul.f32 %v644_v60, %v880_v26  ;;  %vm344_vm11 = vweird.f32 %v880_v26 }
  0x33   : > { %v322_v1 = vsub.f32 1.0, %v321_v59  ;;  %v940_v4 = vpop.eup %645  ;;  %v291_v6 = vmul.f32 %v903_v41, %v290_v53  ;;  %vm345_vm12 = vweird.f32 %v644_v60  ;;  %vm294_vm13 = vweird.f32 %v903_v41 }
  0x34   : > { %v277_v61 = vadd.f32 %v636_v34, %v276_v52  ;;  %v308_v0 = vmul.f32 %v640_v46, %v307_v57  ;;  %v341_v13 = vsub.f32 1.0, %v340_v2  ;;  %vm957_vm14 = vcmp.eq.f32.partialorder %v297_v44, 8.507059e+37  ;;  %vm979_vm3 = vmor %vm344_vm11, %vm345_vm12 }
  0x35   : > { %v323_v12 = vmul.f32 %v920_v51, %v322_v1  ;;  %vm961_vm15 = vcmp.eq.f32.partialorder %v329_v62, 8.507059e+37  ;;  %vm965_vm1 = vcmp.eq.f32.partialorder %v348_v63, 8.507059e+37  ;;  %v355_v18 = vmul.f32 %v940_v4, %v888_v32 }
  0x36   : > { %v281_v5 = vsel %vm929_vm8, %v636_v34, %v277_v61  ;;  %v309_v11 = vadd.f32 %v640_v46, %v308_v0  ;;  %v342_v23 = vmul.f32 %v644_v60, %v341_v13  ;;  %v351_v25 = vor.u32 1.1754944e-38, %v350_v3  ;;  %v648_v27 = vpop.eup %647  ;;  %vm990_vm8 = vmor %vm293_vm4, %vm294_vm13 }
  0x37   : > { %v286_v14 = vsel %vm905_vm2, %v285_v43, %v281_v5  ;;  %vm326_vm2 = vweird.f32 %v920_v51  ;;  %v292_v29 = vadd.f32 %v903_v41, %v291_v6  ;;  %v356_v37 = vsub.f32 1.0, %v355_v18 }
  0x38   : > { %v313_v20 = vsel %vm948_vm10, %v640_v46, %v309_v11  ;;  %vm359_vm5 = vweird.f32 %v888_v32  ;;  %v287_v39 = vmul.f32 %v286_v14, %v237_v31  ;;  %v324_v26 = vadd.f32 %v920_v51, %v323_v12 }
  0x39   : > { %v318_v30 = vsel %vm922_vm7, %v317_v58, %v313_v20  ;;  %v343_v42 = vadd.f32 %v644_v60, %v342_v23  ;;  %v372_v43 = vmul.f32 %v648_v27, %v894_v36  ;;  %vm1002_vm7 = vmor %vm325_vm6, %vm326_vm2  ;;  %v357_v46 = vmul.f32 %v940_v4, %v356_v37 }
  0x3a   : > { %v319_v44 = vmul.f32 %v318_v30, %v257_v35  ;;  %v363_v47 = vand.u32 2147483647, %v888_v32  ;;  %v365_v48 = vand.u32 2147483648, %v888_v32  ;;  %vm376_vm4 = vweird.f32 %v894_v36 }
  0x3b   : > { %v347_v50 = vsel %vm979_vm3, %v644_v60, %v343_v42  ;;  %v373_v52 = vsub.f32 1.0, %v372_v43  ;;  %vm377_vm9 = vweird.f32 %v648_v27  ;;  %vm360_vm6 = vweird.f32 %v940_v4 }
  0x3c   : > { %v352_v53 = vsel %vm965_vm1, %v351_v25, %v347_v50  ;;  %v380_v54 = vand.u32 2147483647, %v894_v36  ;;  %v382_v55 = vand.u32 2147483648, %v894_v36  ;;  %v296_v56 = vsel %vm990_vm8, %v903_v41, %v292_v29  ;;  %vm1024_vm10 = vmor %vm376_vm4, %vm377_vm9 }
  0x3d   : > { %v303_v57 = vfloor.f32 %v287_v39  ;;  %v328_v58 = vsel %vm1002_vm7, %v920_v51, %v324_v26  ;;  %v374_v59 = vmul.f32 %v648_v27, %v373_v52  ;;  %v335_v60 = vfloor.f32 %v319_v44  ;;  %vm1033_vm11 = vmor %vm359_vm5, %vm360_vm6  ;;  %v415_v26 = vld [vmem:[#allocation2] sm:$0xff] }
  0x3e   : > { %v358_v61 = vadd.f32 %v940_v4, %v357_v46  ;;  %v383_v63 = vor.u32 1.1754944e-38, %v382_v55  ;;  %649 = vrcp.f32 %v898_v38  ;;  %v353_v36 = vmul.f32 %v352_v53, %v237_v31 }
  0x3f   : > { %v375_v51 = vadd.f32 %v648_v27, %v374_v59  ;;  %vm381_vm12 = vcmp.eq.f32.partialorder %v380_v54, 8.507059e+37  ;;  %v238_v0 = vfloor.f32 %v883_v28  ;;  %v258_v1 = vfloor.f32 %v890_v33  ;;  %v416_v59 = vld [vmem:[#allocation2 + $0x8] sm:$0xff] }
  0x40   : > { %v366_v2 = vor.u32 1.1754944e-38, %v365_v48  ;;  %v301_v3 = vsel %vm957_vm14, %v915_v49, %v296_v56  ;;  %v333_v19 = vsel %vm961_vm15, %v332_v9, %v328_v58  ;;  %v405_v32 = vmul.f32 %v352_v53, %v866_v7 }
  0x41   : > { %v379_v31 = vsel %vm1024_vm10, %v648_v27, %v375_v51  ;;  %v337_v5 = vsub.f32 %v303_v57, %v335_v60  ;;  %v362_v28 = vsel %vm1033_vm11, %v940_v4, %v358_v61  ;;  %vm364_vm13 = vcmp.eq.f32.partialorder %v363_v47, 8.507059e+37 }
  0x42   : > { %v384_v33 = vsel %vm381_vm12, %v383_v63, %v379_v31  ;;  %v369_v6 = vfloor.f32 %v353_v36  ;;  %v407_v49 = vfloor.f32 %v405_v32  ;;  %v302_v12 = vmul.f32 %v301_v3, %v238_v0 }
  0x43   : > { %v385_v8 = vmul.f32 %v384_v33, %v257_v35  ;;  %v409_v11 = vmul.f32 %v384_v33, %v873_v21  ;;  %v334_v13 = vmul.f32 %v333_v19, %v258_v1  ;;  %v367_v14 = vsel %vm364_vm13, %v366_v2, %v362_v28 }
  0x44   : > { %v650_v9 = vpop.eup %649  ;;  %vm391_vm14 = vweird.f32 %v898_v38  ;;  %v395_v4 = vand.u32 2147483647, %v898_v38  ;;  %v397_v17 = vand.u32 2147483648, %v898_v38  ;;  %v417_v18 = vmul.f32 %v337_v5, %v337_v5 }
  0x45   : > { %v387_v7 = vmul.f32 %v650_v9, %v898_v38  ;;  %v401_v15 = vfloor.f32 %v385_v8  ;;  %v411_v16 = vfloor.f32 %v409_v11  ;;  %vm392_vm15 = vweird.f32 %v650_v9 }
  0x46   : > { %v304_v27 = vfloor.f32 %v302_v12  ;;  %v336_v29 = vfloor.f32 %v334_v13  ;;  %v368_v30 = vmul.f32 %v367_v14, %v238_v0  ;;  %vm393_vm1 = vmor %vm391_vm14, %vm392_vm15  ;;  %v398_v34 = vor.u32 1.1754944e-38, %v397_v17 }
  0x47   : > { %v388_v24 = vsub.f32 1.0, %v387_v7  ;;  %v403_v35 = vsub.f32 %v369_v6, %v401_v15  ;;  %v413_v20 = vsub.f32 %v407_v49, %v411_v16  ;;  %vm396_vm2 = vcmp.eq.f32.partialorder %v395_v4, 8.507059e+37 }
  0x48   : > { %v406_v39 = vmul.f32 %v367_v14, %v868_v10  ;;  %v338_v43 = vsub.f32 %v304_v27, %v336_v29  ;;  %v370_v44 = vfloor.f32 %v368_v30  ;;  %vm450_vm3 = vcmask 0  }
  0x49   : > { %v389_v21 = vmul.f32 %v650_v9, %v388_v24  ;;  %v419_v23 = vmul.f32 %v403_v35, %v403_v35  ;;  %v423_v25 = vmul.f32 %v413_v20, %v413_v20 }
  0x4a   : > { %v408_v47 = vfloor.f32 %v406_v39  ;;  %v418_v56 = vmul.f32 %v338_v43, %v338_v43 }
  0x4b   : > { %v390_v37 = vadd.f32 %v650_v9, %v389_v21  ;;  %v421_v40 = vadd.f32 %v419_v23, %v417_v18 }
  0x4d   : > { %v394_v38 = vsel %vm393_vm1, %v650_v9, %v390_v37  ;;  %v425_v42 = vadd.f32 %v423_v25, %v421_v40 }
  0x4e   : > { %v399_v45 = vsel %vm396_vm2, %v398_v34, %v394_v38 }
  0x4f   : > { %v400_v46 = vmul.f32 %v399_v45, %v258_v1  ;;  %v410_v48 = vmul.f32 %v399_v45, %v875_v22  ;;  %v427_v50 = vadd.f32 %v425_v42, %v415_v26 }
  0x51   : > { %v402_v52 = vfloor.f32 %v400_v46  ;;  %v412_v53 = vfloor.f32 %v410_v48  ;;  %430 = vst.msk [vmem:[#allocation2] sm:$0xff] %vm230_vm0, %v427_v50 }
  0x53   : > { %v404_v54 = vsub.f32 %v370_v44, %v402_v52  ;;  %v414_v55 = vsub.f32 %v408_v47, %v412_v53 }
  0x55   : > { %v420_v10 = vmul.f32 %v404_v54, %v404_v54  ;;  %v424_v57 = vmul.f32 %v414_v55, %v414_v55 }
  0x57   : > { %v422_v58 = vadd.f32 %v420_v10, %v418_v56 }
  0x58   : > { %v435_v62 = vld [vmem:[#allocation2] sm:$0xff] }
  0x59   : > { %v426_v60 = vadd.f32 %v424_v57, %v422_v58  ;;  %v437_v22 = vsel %vm230_vm0, %v435_v62, 0.0 }
  0x5b   : > { %v428_v61 = vadd.f32 %v426_v60, %v416_v59 }
  0x5d   : > { %431 = vst.msk [vmem:[#allocation2 + $0x8] sm:$0xff] %vm230_vm0, %v428_v61 }
  0x64   : > { %v436_v63 = vld [vmem:[#allocation2 + $0x8] sm:$0xff] }
  0x65   : > { %v438_v36 = vsel %vm230_vm0, %v436_v63, 0.0 }
  0x66   : > { %v439_v41 = vadd.f32 %v438_v36, %v437_v22 }
  0x68   : > { %440 = vadd.xlane.f32.xlu0 %v439_v41 }
  0xdb   : > { %v441_v51 = vpop.xlane.xlu0 %440 }
  0xdc   : > { %v442_v0 = vrot.slane %v441_v51, 4 }
  0xde   : > { %v443_v1 = vadd.f32 %v442_v0, %v441_v51 }
  0xe0   : > { %v444_v2 = vrot.slane %v443_v1, 2 }
  0xe2   : > { %v445_v3 = vadd.f32 %v444_v2, %v443_v1 }
  0xe4   : > { %v446_v19 = vrot.slane %v445_v3, 1 }
  0xe6   : > { %v447_v31 = vadd.f32 %v446_v19, %v445_v3 }
  0xe8   : > { %570 = vpush %v447_v31 }
 0x119   : > { %s571_s29 = spop %570 }
 0x11a   : > { %v449_v32 = vstv %s571_s29 }
 0x11b   : > { %451 = vst.msk [vmem:[%s225_s27] sm:$0x1] %vm450_vm3, %v449_v32 }
 0x11c PF: > { %s18_s14 = sadd.s32 1, %s765_s14   ;;  %s1115_s9 = smov %s749_s10 }
 0x11d   : > { %p15_p0 = scmp.ge.s32.totalorder %s18_s14, 4   ;;  %s1116_s10 = smov %s753_s11 }
 0x11e   : > { %s1117_s11 = smov %s830_s20  ;;  %s1118_s12 = smov %s761_s13 }
 0x11f   : > { %s1119_s13 = smov %s1121_s16  ;;  %17 = sbr.rel (!%p15_p0) target bundleno = 6 (0x6), region = 93 }
 0x124   :  { %469 = vsyncpa [#allocation4], 1 }
 0x125   :  { %471 = vsyncpa [#allocation4 + $0x1], 1 }
 0x126   :  { %472 = vsyncpa [#allocation6], 1 }
 0x127   :  { %474 = vsyncpa [#allocation6 + $0x1], 1 }

</bundles_post_ra>
